<compile_context>
chip_gen: v7x
topology: tpu7x:2x2x1
jax: 0.10.0
libtpu: 0.0.40
codegen_flags: <defaults>
</compile_context>

<pallas_src>
import functools

import jax
import jax.numpy as jnp
from jax import lax
from jax.experimental import pallas as pl
from jax.experimental.pallas import tpu as pltpu


def head_kernel(x_ref, wqkv_ref, o_ref, *, B, T, H):
    # x_ref: (B*T, C) f32, wqkv_ref: (C, 3H) f32 = [Wq | Wk | Wv],
    # o_ref: (B*T, H) f32.
    scale = H ** (-0.5)

    # Fused QKV projection for the WHOLE batch: one MXU matmul, f32 acc.
    qkv = jnp.dot(x_ref[...], wqkv_ref[...],
                  preferred_element_type=jnp.float32)            # (B*T, 3H)

    # Causal (lower-triangular) mask, built once and reused for every batch
    # element == masked_fill(tril == 0, -inf).
    row = lax.broadcasted_iota(jnp.int32, (T, T), 0)
    col = lax.broadcasted_iota(jnp.int32, (T, T), 1)
    causal = col <= row

    # Per-batch attention, statically unrolled (B known at trace time).
    for b in range(B):
        r0 = b * T                       # static offset, sublane-aligned (T % 8 == 0)
        q = qkv[r0:r0 + T, :H] * scale   # pre-scaled q: scaling (T,H) not (T,T)
        k = qkv[r0:r0 + T, H:2 * H]
        v = qkv[r0:r0 + T, 2 * H:]

        # Attention scores (T, T): contract last dims of q and k directly
        # (no materialized transpose of k).
        wei = lax.dot_general(
            q, k,
            dimension_numbers=(((1,), (1,)), ((), ())),
            preferred_element_type=jnp.float32,
        )
        wei = jnp.where(causal, wei, -jnp.inf)

        # Softmax along the last axis (diagonal always unmasked -> no NaN rows).
        wei = wei - jnp.max(wei, axis=-1, keepdims=True)
        p = jnp.exp(wei)
        p = p * pl.reciprocal(jnp.sum(p, axis=-1, keepdims=True), approx=True)

        # dropout(p=0.0) is identity -> skipped.
        # TODO(synk): if config.dropout ever becomes nonzero, add a
        # pltpu.prng_seed + pltpu.stateful_bernoulli mask here.

        out = jnp.dot(p, v, preferred_element_type=jnp.float32)  # (T, H)
        o_ref[r0:r0 + T, :] = out.astype(o_ref.dtype)


def head_forward(x, w_qkv):
    """x: (B, T, C) float32; w_qkv: (C, 3H) float32, pre-fused [Wq | Wk | Wv]
    (built once at parameter-setup time, NOT per forward call)."""
    B, T, C = x.shape
    H = w_qkv.shape[1] // 3

    # Metadata-only reshape outside the kernel: one (B*T, C) slab.
    x2d = x.reshape(B * T, C)

    out2d = pl.pallas_call(
        functools.partial(head_kernel, B=B, T=T, H=H),
        out_shape=jax.ShapeDtypeStruct((B * T, H), x.dtype),
        grid=(1,),  # single grid step: batch handled inside the kernel
        in_specs=[
            pl.BlockSpec((B * T, C), lambda i: (0, 0)),
            pl.BlockSpec((C, 3 * H), lambda i: (0, 0)),
        ],
        out_specs=pl.BlockSpec((B * T, H), lambda i: (0, 0)),
        compiler_params=pltpu.CompilerParams(
            dimension_semantics=("arbitrary",),
        ),
    )(x2d, w_qkv)

    return out2d.reshape(B, T, H)


def head_reference(x, wq_t, wk_t, wv_t):
    """Pure-JAX f32 reference matching the PyTorch forward."""
    q = x @ wq_t
    k = x @ wk_t
    v = x @ wv_t
    scale = k.shape[-1] ** (-0.5)
    wei = jnp.einsum("btd,bsd->bts", q, k) * scale
    T = x.shape[1]
    tril = jnp.tril(jnp.ones((T, T), dtype=bool))
    wei = jnp.where(tril, wei, -jnp.inf)
    wei = jax.nn.softmax(wei, axis=-1)
    return jnp.einsum("bts,bsd->btd", wei, v)


if __name__ == "__main__":
    # ModelConfig: n_embd=32, n_head=2, block_size=32 -> head_size = 16
    B = 2
    T = 32          # block_size (sequence length)
    C = 32          # n_embd
    H = 16          # head_size = n_embd // n_head

    key = jax.random.PRNGKey(0)
    kx, kk, kq, kv = jax.random.split(key, 4)

    x = jax.random.normal(kx, (B, T, C), dtype=jnp.float32)

    # nn.Linear weights (head_size, n_embd) ~ N(0, 0.02), no bias.
    # Stored transposed as (C, H) so the kernel uses plain x @ W.
    wk_t = (0.02 * jax.random.normal(kk, (H, C), dtype=jnp.float32)).T
    wq_t = (0.02 * jax.random.normal(kq, (H, C), dtype=jnp.float32)).T
    wv_t = (0.02 * jax.random.normal(kv, (H, C), dtype=jnp.float32)).T

    # One-time weight transform (parameter-setup time, not per forward call):
    # fuse the three projection weights into one (C, 3H) slab [q | k | v].
    w_qkv = jnp.concatenate([wq_t, wk_t, wv_t], axis=1)

    out = head_forward(x, w_qkv)
    out = jax.block_until_ready(out)

    ref = head_reference(x, wq_t, wk_t, wv_t)
    assert out.shape == (B, T, H), out.shape
    # f32 matmuls throughout; approx (EUP) reciprocal in the softmax is the
    # only approximation left, so the error is typically <1e-3.
    max_err = float(jnp.max(jnp.abs(out - ref)))
    assert jnp.allclose(out, ref, atol=1e-2, rtol=1e-2), max_err

    print("KERNEL_OK")
</pallas_src>

<mosaic_0001>
module attributes {stable_mosaic.version = 11 : i64} {
  func.func @head_kernel(%arg0: i32, %arg1: memref<64x32xf32, #tpu.memory_space<vmem>>, %arg2: memref<32x48xf32, #tpu.memory_space<vmem>>, %arg3: memref<64x16xf32, #tpu.memory_space<vmem>>) attributes {dimension_semantics = [#tpu.dimension_semantics<arbitrary>], iteration_bounds = array<i64: 1>, scalar_prefetch = 0 : i64, scratch_operands = 0 : i64, tpu.core_type = #tpu.core_type<tc>, window_params = [{pipeline_mode = #tpu.pipeline_mode<synchronous>, transform_indices = @transform_0, window_bounds = array<i64: 64, 32>}, {pipeline_mode = #tpu.pipeline_mode<synchronous>, transform_indices = @transform_1, window_bounds = array<i64: 32, 48>}, {pipeline_mode = #tpu.pipeline_mode<synchronous>, transform_indices = @transform_2, window_bounds = array<i64: 64, 16>}]} {
    %c0 = arith.constant 0 : index
    %c0_0 = arith.constant 0 : index
    %0 = vector.load %arg1[%c0, %c0_0] : memref<64x32xf32, #tpu.memory_space<vmem>>, vector<64x32xf32>
    %c0_1 = arith.constant 0 : index
    %c0_2 = arith.constant 0 : index
    %1 = vector.load %arg2[%c0_1, %c0_2] : memref<32x48xf32, #tpu.memory_space<vmem>>, vector<32x48xf32>
    %cst = arith.constant dense<0.000000e+00> : vector<64x48xf32>
    %2 = tpu.matmul %0, %1, %cst {dimension_numbers = #tpu.dot_dimension_numbers<[1], [0], [0], [1], [0, 0, 1, 1], [], []>} : vector<64x32xf32>, vector<32x48xf32>, vector<64x48xf32> -> vector<64x48xf32>
    %3 = tpu.iota {dimensions = array<i32: 0>} : vector<32x32xi32>
    %4 = tpu.iota {dimensions = array<i32: 1>} : vector<32x32xi32>
    %5 = arith.cmpi sle, %4, %3 : vector<32x32xi32>
    %6 = vector.extract_strided_slice %2 {offsets = [0, 0], sizes = [32, 16], strides = [1, 1]} : vector<64x48xf32> to vector<32x16xf32>
    %cst_3 = arith.constant 2.500000e-01 : f32
    %7 = vector.broadcast %cst_3 : f32 to vector<32x16xf32>
    %8 = arith.mulf %6, %7 : vector<32x16xf32>
    %9 = vector.extract_strided_slice %2 {offsets = [0, 16], sizes = [32, 16], strides = [1, 1]} : vector<64x48xf32> to vector<32x16xf32>
    %10 = vector.extract_strided_slice %2 {offsets = [0, 32], sizes = [32, 16], strides = [1, 1]} : vector<64x48xf32> to vector<32x16xf32>
    %cst_4 = arith.constant dense<0.000000e+00> : vector<32x32xf32>
    %11 = tpu.matmul %8, %9, %cst_4 {dimension_numbers = #tpu.dot_dimension_numbers<[1], [1], [0], [0], [0, 0, 1, 0], [], []>} : vector<32x16xf32>, vector<32x16xf32>, vector<32x32xf32> -> vector<32x32xf32>
    %cst_5 = arith.constant 0xFF800000 : f32
    %12 = vector.broadcast %cst_5 : f32 to vector<32x32xf32>
    %13 = arith.select %5, %11, %12 : vector<32x32xi1>, vector<32x32xf32>
    %cst_6 = arith.constant dense<0xFF800000> : vector<32xf32>
    %14 = vector.multi_reduction <maximumf>, %13, %cst_6 [1] : vector<32x32xf32> to vector<32xf32>
    %15 = vector.shape_cast %14 : vector<32xf32> to vector<32x1xf32>
    %16 = vector.broadcast %15 : vector<32x1xf32> to vector<32x32xf32>
    %17 = arith.subf %13, %16 : vector<32x32xf32>
    %18 = math.exp %17 : vector<32x32xf32>
    %cst_7 = arith.constant dense<0.000000e+00> : vector<32xf32>
    %19 = vector.multi_reduction <add>, %18, %cst_7 [1] : vector<32x32xf32> to vector<32xf32>
    %20 = vector.shape_cast %19 : vector<32xf32> to vector<32x1xf32>
    %21 = tpu.reciprocal %20 {approx = true} : vector<32x1xf32> -> vector<32x1xf32>
    %22 = vector.broadcast %21 : vector<32x1xf32> to vector<32x32xf32>
    %23 = arith.mulf %18, %22 : vector<32x32xf32>
    %cst_8 = arith.constant dense<0.000000e+00> : vector<32x16xf32>
    %24 = tpu.matmul %23, %10, %cst_8 {dimension_numbers = #tpu.dot_dimension_numbers<[1], [0], [0], [1], [0, 0, 1, 1], [], []>} : vector<32x32xf32>, vector<32x16xf32>, vector<32x16xf32> -> vector<32x16xf32>
    %c0_9 = arith.constant 0 : index
    %c0_10 = arith.constant 0 : index
    %25 = vector.load %arg3[%c0_9, %c0_10] : memref<64x16xf32, #tpu.memory_space<vmem>>, vector<32x16xf32>
    tpu.vector_store %arg3[%c0_9, %c0_10], %24 {strides = array<i32>} : memref<64x16xf32, #tpu.memory_space<vmem>>, vector<32x16xf32>,
    %26 = vector.extract_strided_slice %2 {offsets = [32, 0], sizes = [32, 16], strides = [1, 1]} : vector<64x48xf32> to vector<32x16xf32>
    %cst_11 = arith.constant 2.500000e-01 : f32
    %27 = vector.broadcast %cst_11 : f32 to vector<32x16xf32>
    %28 = arith.mulf %26, %27 : vector<32x16xf32>
    %29 = vector.extract_strided_slice %2 {offsets = [32, 16], sizes = [32, 16], strides = [1, 1]} : vector<64x48xf32> to vector<32x16xf32>
    %30 = vector.extract_strided_slice %2 {offsets = [32, 32], sizes = [32, 16], strides = [1, 1]} : vector<64x48xf32> to vector<32x16xf32>
    %cst_12 = arith.constant dense<0.000000e+00> : vector<32x32xf32>
    %31 = tpu.matmul %28, %29, %cst_12 {dimension_numbers = #tpu.dot_dimension_numbers<[1], [1], [0], [0], [0, 0, 1, 0], [], []>} : vector<32x16xf32>, vector<32x16xf32>, vector<32x32xf32> -> vector<32x32xf32>
    %cst_13 = arith.constant 0xFF800000 : f32
    %32 = vector.broadcast %cst_13 : f32 to vector<32x32xf32>
    %33 = arith.select %5, %31, %32 : vector<32x32xi1>, vector<32x32xf32>
    %cst_14 = arith.constant dense<0xFF800000> : vector<32xf32>
    %34 = vector.multi_reduction <maximumf>, %33, %cst_14 [1] : vector<32x32xf32> to vector<32xf32>
    %35 = vector.shape_cast %34 : vector<32xf32> to vector<32x1xf32>
    %36 = vector.broadcast %35 : vector<32x1xf32> to vector<32x32xf32>
    %37 = arith.subf %33, %36 : vector<32x32xf32>
    %38 = math.exp %37 : vector<32x32xf32>
    %cst_15 = arith.constant dense<0.000000e+00> : vector<32xf32>
    %39 = vector.multi_reduction <add>, %38, %cst_15 [1] : vector<32x32xf32> to vector<32xf32>
    %40 = vector.shape_cast %39 : vector<32xf32> to vector<32x1xf32>
    %41 = tpu.reciprocal %40 {approx = true} : vector<32x1xf32> -> vector<32x1xf32>
    %42 = vector.broadcast %41 : vector<32x1xf32> to vector<32x32xf32>
    %43 = arith.mulf %38, %42 : vector<32x32xf32>
    %cst_16 = arith.constant dense<0.000000e+00> : vector<32x16xf32>
    %44 = tpu.matmul %43, %30, %cst_16 {dimension_numbers = #tpu.dot_dimension_numbers<[1], [0], [0], [1], [0, 0, 1, 1], [], []>} : vector<32x32xf32>, vector<32x16xf32>, vector<32x16xf32> -> vector<32x16xf32>
    %c32 = arith.constant 32 : index
    %c0_17 = arith.constant 0 : index
    %45 = vector.load %arg3[%c32, %c0_17] : memref<64x16xf32, #tpu.memory_space<vmem>>, vector<32x16xf32>
    tpu.vector_store %arg3[%c32, %c0_17], %44 {strides = array<i32>} : memref<64x16xf32, #tpu.memory_space<vmem>>, vector<32x16xf32>,
    return
  }
  func.func @transform_0(%arg0: i32) -> (i32, i32) {
    %c0_i32 = arith.constant 0 : i32
    %c0_i32_0 = arith.constant 0 : i32
    %c0_i32_1 = arith.constant 0 : i32
    return %c0_i32, %c0_i32_0 : i32, i32
  }
  func.func @transform_1(%arg0: i32) -> (i32, i32) {
    %c0_i32 = arith.constant 0 : i32
    %c0_i32_0 = arith.constant 0 : i32
    %c0_i32_1 = arith.constant 0 : i32
    return %c0_i32, %c0_i32_0 : i32, i32
  }
  func.func @transform_2(%arg0: i32) -> (i32, i32) {
    %c0_i32 = arith.constant 0 : i32
    %c0_i32_0 = arith.constant 0 : i32
    %c0_i32_1 = arith.constant 0 : i32
    return %c0_i32, %c0_i32_0 : i32, i32
  }
}

</mosaic_0001>

<bundles_post_ra>
// kernel: tpu_custom_call.1
= control target key start
LH: loop header
LB: loop body
LE: loop exit
PB: predicated region body
PF: predicated region fallthrough
CT: control target
= control target key end

     0   :  { %vm23_vm0 = vcmask 261120   ;;  %vm180_vm1 = vcmask 130048   ;;  %s1007_s4 = smov 112   ;;  %v153_v51 = vlaneseq  ;;  %s1206_s1 = inlined_call_operand.vmem [shape: f32[32,48], index: 1, kind: input, shape index: {}]   ;;  %s1207_s0 = inlined_call_operand.vmem [shape: f32[64,32], index: 0, kind: input, shape index: {}]   ;;  %s1208_s2 = inlined_call_operand.vmem [shape: f32[64,16], index: 2, kind: output, shape index: {}]  }
   0x1   :  { %v19_v0 = vld [vmem:[%s1206_s1] sm:$0xff]  ;;  %v20_v1 = vld [vmem:[%s1206_s1 + $0x8] sm:$0xff]  ;;  %v21_v2 = vld [vmem:[%s1206_s1 + $0x10] sm:$0xff] }
   0x2   :  { %v885_v3 = vpack.c.bf16 %v20_v1, %v19_v0  ;;  %v22_v4 = vld [vmem:[%s1206_s1 + $0x18] sm:$0xff]  ;;  %v11_v5 = vld [vmem:[%s1207_s0] sm:$0xff]  ;;  %v12_v7 = vld [vmem:[%s1207_s0 + $0x8] sm:$0xff]  ;;  %v154_v52 = vshrl.u32 %v153_v51, 7  ;;  %v159_v54 = vand.u32 127, %v153_v51 }
   0x3   :  { %v889_v6 = vpack.c.bf16 %v22_v4, %v21_v2  ;;  %817 = vmatprep.mubr.msk.f32.mxu0 %vm23_vm0, %v11_v5  ;;  %v13_v8 = vld [vmem:[%s1207_s0 + $0x10] sm:$0xff]  ;;  %v14_v9 = vld [vmem:[%s1207_s0 + $0x18] sm:$0xff]  ;;  %v15_v10 = vld [vmem:[%s1207_s0 + $0x20] sm:$0xff] }
   0x4   :  { %886 = vmatprep.subr.bf16.mxu0 %v885_v3  ;;  %v16_v11 = vld [vmem:[%s1207_s0 + $0x28] sm:$0xff]  ;;  %v17_v12 = vld [vmem:[%s1207_s0 + $0x30] sm:$0xff]  ;;  %v18_v13 = vld [vmem:[%s1207_s0 + $0x38] sm:$0xff]  ;;  %v155_v53 = vadd.s32 8, %v154_v52  ;;  %vm160_vm4 = vcmp.le.s32.totalorder %v159_v54, %v154_v52  ;;  %v156_v55 = vadd.s32 16, %v154_v52  ;;  %v157_v59 = vadd.s32 24, %v154_v52 }
   0x5   :  { %888 = vmatpush3.bf16.msra.mxu0 %v885_v3  ;;  %vm1083_vm2 = vmpackc.low %vm180_vm1, %vm180_vm1  ;;  %s1008_s0 = smov 96  }
   0x6   :  { %890 = vmatprep.subr.bf16.mxu0 %v889_v6  ;;  %vm161_vm3 = vcmp.le.s32.totalorder %v159_v54, %v155_v53  ;;  %vm162_vm5 = vcmp.le.s32.totalorder %v159_v54, %v156_v55  ;;  %vm163_vm6 = vcmp.le.s32.totalorder %v159_v54, %v157_v59 }
   0x9   :  { %892 = vmatpush3.bf16.msra.mxu0 %v889_v6 }
   0xc   :  { %818 = vmatmul.mubr.msk.f32.vlgmr.msra.gmra.mrb[0].mxu0 %vm23_vm0, %v12_v7 }
   0xd   :  { %820 = vmatprep.mubr.msk.f32.mxu0 %vm23_vm0, %v13_v8 }
  0x10   :  { %821 = vmatmul.mubr.msk.f32.gmra.mrb[2].mxu0 %vm23_vm0, %v14_v9 }
  0x11   :  { %823 = vmatprep.mubr.msk.f32.mxu0 %vm23_vm0, %v15_v10 }
  0x14   :  { %824 = vmatmul.mubr.msk.f32.gmra.mrb[4].mxu0 %vm23_vm0, %v16_v11 }
  0x15   :  { %826 = vmatprep.mubr.msk.f32.mxu0 %vm23_vm0, %v17_v12 }
  0x18   :  { %827 = vmatmul.mubr.msk.f32.gmra.mrb[6].mxu0 %vm23_vm0, %v18_v13 }
  0xdf   :  { %v819_v14 = vpop.f32.mrb[0].mxu0 }
  0xe0   :  { %v114_v15 = vpop.f32.mrb[1].mxu0  ;;  %v165_v43 = vmul.f32 0.25, %v819_v14 }
  0xe1   :  { %v1068_v16 = vpack.i.bf16 %v819_v14, %v114_v15  ;;  %v164_v17 = vmul.f32 0.25, %v114_v15 }
  0xe3   :  { %936 = vrot.lane.b32.xlu0 %v1068_v16, %s1007_s4  ;;  %837 = vmatprep.mubr.msk.f32.mxu1 %vm180_vm1, %v164_v17  ;;  %v822_v18 = vpop.f32.mrb[2].mxu0 }
  0xe4   :  { %v124_v19 = vpop.f32.mrb[3].mxu0  ;;  %v167_v46 = vmul.f32 0.25, %v822_v18 }
  0xe5   :  { %v1072_v20 = vpack.i.bf16 %v822_v18, %v124_v19  ;;  %v166_v45 = vmul.f32 0.25, %v124_v19 }
  0xe7   :  { %941 = vrot.lane.b32.xlu0 %v1072_v20, %s1007_s4  ;;  %v825_v21 = vpop.f32.mrb[4].mxu0 }
  0xe8   :  { %v134_v22 = vpop.f32.mrb[5].mxu0  ;;  %v448_v48 = vmul.f32 0.25, %v825_v21 }
  0xe9   :  { %v1075_v23 = vpack.i.bf16 %v825_v21, %v134_v22  ;;  %v447_v47 = vmul.f32 0.25, %v134_v22 }
  0xeb   :  { %946 = vrot.lane.b32.xlu1 %v1075_v23, %s1007_s4  ;;  %v828_v24 = vpop.f32.mrb[6].mxu0 }
  0xec   :  { %v144_v25 = vpop.f32.mrb[7].mxu0  ;;  %v450_v50 = vmul.f32 0.25, %v828_v24 }
  0xed   :  { %v1078_v26 = vpack.i.bf16 %v828_v24, %v144_v25  ;;  %v449_v49 = vmul.f32 0.25, %v144_v25 }
  0xef   :  { %951 = vrot.lane.b32.xlu1 %v1078_v26, %s1007_s4 }
 0x155   :  { %v937_v27 = vpop.permute.xlu0 %936 }
 0x156   :  { %v939_v28 = vunpack.i.h.bf16 %v937_v27  ;;  %v938_v29 = vunpack.i.l.bf16 %v937_v27 }
 0x158   :  { %v893_v31 = vpack.c.bf16 %v939_v28, %v938_v29 }
 0x159   :  { %v942_v32 = vpop.permute.xlu0 %941 }
 0x15a   :  { %895 = vmatprep.subr.msk.bf16.mxu1 %vm1083_vm2, %v893_v31  ;;  %v944_v33 = vunpack.i.h.bf16 %v942_v32  ;;  %v943_v34 = vunpack.i.l.bf16 %v942_v32 }
 0x15b   :  { %898 = vmatpush3.bf16.xpose.msk.msra.mxu1 %vm1083_vm2, %v893_v31 }
 0x15c   :  { %v899_v35 = vpack.c.bf16 %v944_v33, %v943_v34 }
 0x15d   :  { %v947_v36 = vpop.permute.xlu1 %946 }
 0x15e   :  { %901 = vmatprep.subr.msk.bf16.mxu1 %vm1083_vm2, %v899_v35  ;;  %v949_v37 = vunpack.i.h.bf16 %v947_v36  ;;  %v948_v38 = vunpack.i.l.bf16 %v947_v36 }
 0x160   :  { %v913_v39 = vpack.c.bf16 %v949_v37, %v948_v38 }
 0x161   :  { %v952_v40 = vpop.permute.xlu1 %951 }
 0x162   :  { %v954_v41 = vunpack.i.h.bf16 %v952_v40  ;;  %v953_v42 = vunpack.i.l.bf16 %v952_v40 }
 0x163   :  { %904 = vmatpush3.bf16.xpose.msk.msra.mxu1 %vm1083_vm2, %v899_v35 }
 0x164   :  { %915 = vmatprep.subr.msk.bf16.mxu1 %vm1083_vm2, %v913_v39  ;;  %v919_v44 = vpack.c.bf16 %v954_v41, %v953_v42 }
 0x16a   :  { %838 = vmatmul.mubr.msk.f32.vlgmr.msra.gmra.mrb[0].mxu1 %vm180_vm1, %v165_v43 }
 0x16b   :  { %840 = vmatprep.mubr.msk.f32.mxu1 %vm180_vm1, %v166_v45  ;;  %918 = vmatpush3.bf16.xpose.msk.msra.mxu1 %vm1083_vm2, %v913_v39 }
 0x16c   :  { %921 = vmatprep.subr.msk.bf16.mxu1 %vm1083_vm2, %v919_v44 }
 0x16e   :  { %841 = vmatmul.mubr.msk.f32.gmra.mrb[2].mxu1 %vm180_vm1, %v167_v46 }
 0x16f   :  { %865 = vmatprep.mubr.msk.f32.mxu1 %vm180_vm1, %v447_v47 }
 0x173   :  { %924 = vmatpush3.bf16.xpose.msk.msra.mxu1 %vm1083_vm2, %v919_v44 }
 0x17a   :  { %866 = vmatmul.mubr.msk.f32.vlgmr.msra.gmra.mrb[4].mxu1 %vm180_vm1, %v448_v48 }
 0x17b   :  { %868 = vmatprep.mubr.msk.f32.mxu1 %vm180_vm1, %v449_v49 }
 0x17e   :  { %869 = vmatmul.mubr.msk.f32.gmra.mrb[6].mxu1 %vm180_vm1, %v450_v50 }
 0x23d   :  { %v839_v56 = vpop.f32.mrb[0].mxu1 }
 0x23e   :  { %v287_v57 = vsel %vm161_vm3, %v839_v56, -inf  ;;  %v267_v58 = vpop.f32.mrb[1].mxu1 }
 0x23f   :  { %v286_v60 = vsel %vm160_vm4, %v267_v58, -inf  ;;  %v293_v61 = vsel %vm23_vm0, %v287_v57, -inf }
 0x240   :  { %294 = vmax.xlane.f32.xlu1 %v293_v61  ;;  %v290_v62 = vsel %vm23_vm0, %v286_v60, -inf }
 0x241   :  { %291 = vmax.xlane.f32.xlu0 %v290_v62  ;;  %v842_v63 = vpop.f32.mrb[2].mxu1 }
 0x242   :  { %v277_v0 = vpop.f32.mrb[3].mxu1  ;;  %v289_v3 = vsel %vm163_vm6, %v842_v63, -inf }
 0x243   :  { %v288_v1 = vsel %vm162_vm5, %v277_v0, -inf  ;;  %v299_v4 = vsel %vm23_vm0, %v289_v3, -inf }
 0x244   :  { %v296_v2 = vsel %vm23_vm0, %v288_v1, -inf }
 0x245   :  { %297 = vmax.xlane.f32.xlu0 %v296_v2 }
 0x249   :  { %300 = vmax.xlane.f32.xlu0 %v299_v4 }
 0x24d   :  { %v867_v5 = vpop.f32.mrb[4].mxu1 }
 0x24e   :  { %v569_v6 = vsel %vm161_vm3, %v867_v5, -inf  ;;  %v549_v7 = vpop.f32.mrb[5].mxu1 }
 0x24f   :  { %v568_v8 = vsel %vm160_vm4, %v549_v7, -inf  ;;  %v575_v9 = vsel %vm23_vm0, %v569_v6, -inf }
 0x250   :  { %576 = vmax.xlane.f32.xlu0 %v575_v9  ;;  %v572_v10 = vsel %vm23_vm0, %v568_v8, -inf }
 0x251   :  { %573 = vmax.xlane.f32.xlu1 %v572_v10  ;;  %v870_v11 = vpop.f32.mrb[6].mxu1 }
 0x252   :  { %v571_v12 = vsel %vm163_vm6, %v870_v11, -inf  ;;  %v559_v13 = vpop.f32.mrb[7].mxu1 }
 0x253   :  { %v1124_v14 = vsel %vm162_vm5, %v559_v13, -inf  ;;  %v581_v15 = vsel %vm23_vm0, %v571_v12, -inf }
 0x254   :  { %582 = vmax.xlane.f32.xlu0 %v581_v15  ;;  %v578_v17 = vsel %vm23_vm0, %v1124_v14, -inf }
 0x255   :  { %579 = vmax.xlane.f32.xlu1 %v578_v17 }
 0x266   :  { %956 = vrot.lane.b32.xlu1 %v1068_v16, %s1008_s0 }
 0x2cd   :  { %v295_v18 = vpop.xlane.xlu1 %294 }
 0x2ce   :  { %v303_v19 = vsub.f32 %v287_v57, %v295_v18  ;;  %v292_v21 = vpop.xlane.xlu0 %291 }
 0x2cf   :  { %v302_v22 = vsub.f32 %v286_v60, %v292_v21 }
 0x2d0   :  { %v308_v24 = vmul.f32 1.442695, %v303_v19 }
 0x2d1   :  { %v306_v25 = vmul.f32 1.442695, %v302_v22 }
 0x2d2   :  { %975 = vpow2.f32 %v308_v24  ;;  %v298_v27 = vpop.xlane.xlu0 %297 }
 0x2d3   :  { %977 = vpow2.f32 %v306_v25  ;;  %v304_v28 = vsub.f32 %v288_v1, %v298_v27 }
 0x2d5   :  { %v310_v29 = vmul.f32 1.442695, %v304_v28 }
 0x2d6   :  { %v301_v30 = vpop.xlane.xlu0 %300 }
 0x2d7   :  { %979 = vpow2.f32 %v310_v29  ;;  %v305_v31 = vsub.f32 %v289_v3, %v301_v30 }
 0x2d9   :  { %v312_v32 = vmul.f32 1.442695, %v305_v31 }
 0x2db   :  { %981 = vpow2.f32 %v312_v32 }
 0x2dc   :  { %v1131_v33 = vpop.eup %975 }
 0x2dd   :  { %v978_v34 = vpop.eup %977  ;;  %v577_v16 = vpop.xlane.xlu0 %576  ;;  %v317_v35 = vsel %vm23_vm0, %v1131_v33, 0.0 }
 0x2de   :  { %v585_v36 = vsub.f32 %v569_v6, %v577_v16  ;;  %v574_v37 = vpop.xlane.xlu1 %573  ;;  %318 = vadd.xlane.f32.xlu0 %v317_v35  ;;  %v314_v38 = vsel %vm23_vm0, %v978_v34, 0.0 }
 0x2df   :  { %v584_v39 = vsub.f32 %v568_v8, %v574_v37  ;;  %315 = vadd.xlane.f32.xlu1 %v314_v38 }
 0x2e0   :  { %v590_v40 = vmul.f32 1.442695, %v585_v36 }
 0x2e1   :  { %v1136_v41 = vpop.eup %979  ;;  %v588_v42 = vmul.f32 1.442695, %v584_v39  ;;  %v583_v43 = vpop.xlane.xlu0 %582 }
 0x2e2   :  { %983 = vpow2.f32 %v590_v40  ;;  %v587_v44 = vsub.f32 %v571_v12, %v583_v43  ;;  %v580_v45 = vpop.xlane.xlu1 %579  ;;  %v320_v46 = vsel %vm23_vm0, %v1136_v41, 0.0 }
 0x2e3   :  { %985 = vpow2.f32 %v588_v42  ;;  %321 = vadd.xlane.f32.xlu1 %v320_v46  ;;  %v586_v60 = vsub.f32 %v1124_v14, %v580_v45 }
 0x2e4   :  { %v594_v47 = vmul.f32 1.442695, %v587_v44 }
 0x2e5   :  { %v1140_v48 = vpop.eup %981  ;;  %v592_v61 = vmul.f32 1.442695, %v586_v60 }
 0x2e6   :  { %987 = vpow2.f32 %v594_v47  ;;  %v957_v49 = vpop.permute.xlu1 %956  ;;  %v323_v50 = vsel %vm23_vm0, %v1140_v48, 0.0 }
 0x2e7   :  { %v959_v51 = vunpack.i.h.bf16 %v957_v49  ;;  %v958_v52 = vunpack.i.l.bf16 %v957_v49  ;;  %324 = vadd.xlane.f32.xlu0 %v323_v50  ;;  %989 = vpow2.f32 %v592_v61 }
 0x2e9   :  { %v905_v53 = vpack.c.bf16 %v959_v51, %v958_v52 }
 0x2eb   :  { %906 = vmatprep.subr.bf16.mxu0 %v905_v53 }
 0x2ec   :  { %v1144_v54 = vpop.eup %983  ;;  %908 = vmatpush3.bf16.msra.mxu0 %v905_v53 }
 0x2ed   :  { %v986_v55 = vpop.eup %985  ;;  %v599_v56 = vsel %vm23_vm0, %v1144_v54, 0.0 }
 0x2ee   :  { %600 = vadd.xlane.f32.xlu0 %v599_v56  ;;  %v596_v57 = vsel %vm23_vm0, %v986_v55, 0.0 }
 0x2ef   :  { %597 = vadd.xlane.f32.xlu1 %v596_v57 }
 0x2f0   :  { %v1149_v58 = vpop.eup %987 }
 0x2f1   :  { %v605_v59 = vsel %vm23_vm0, %v1149_v58, 0.0  ;;  %v990_v62 = vpop.eup %989 }
 0x2f2   :  { %606 = vadd.xlane.f32.xlu0 %v605_v59  ;;  %v602_v63 = vsel %vm23_vm0, %v990_v62, 0.0 }
 0x300   :  { %966 = vrot.lane.b32.xlu1 %v1075_v23, %s1008_s0 }
 0x308   :  { %961 = vrot.lane.b32.xlu0 %v1072_v20, %s1008_s0 }
 0x324   :  { %603 = vadd.xlane.f32.xlu1 %v602_v63 }
 0x335   :  { %971 = vrot.lane.b32.xlu1 %v1078_v26, %s1008_s0 }
 0x36b   :  { %v319_v1 = vpop.xlane.xlu0 %318 }
 0x36c   :  { %v316_v0 = vpop.xlane.xlu1 %315 }
 0x36d   :  { %991 = vrcp.f32 %v316_v0 }
 0x36e   :  { %993 = vrcp.f32 %v319_v1 }
 0x370   :  { %v322_v23 = vpop.xlane.xlu1 %321 }
 0x371   :  { %995 = vrcp.f32 %v322_v23 }
 0x374   :  { %v325_v3 = vpop.xlane.xlu0 %324 }
 0x375   :  { %997 = vrcp.f32 %v325_v3 }
 0x377   :  { %v992_v2 = vpop.eup %991 }
 0x378   :  { %v330_v4 = vmul.f32 %v992_v2, %v978_v34  ;;  %v994_v13 = vpop.eup %993 }
 0x379   :  { %v331_v17 = vmul.f32 %v994_v13, %v1131_v33 }
 0x37a   :  { %851 = vmatprep.mubr.msk.f32.mxu0 %vm23_vm0, %v330_v4 }
 0x37b   :  { %v601_v20 = vpop.xlane.xlu0 %600  ;;  %v996_v14 = vpop.eup %995 }
 0x37c   :  { %v598_v5 = vpop.xlane.xlu1 %597  ;;  %v332_v19 = vmul.f32 %v996_v14, %v1136_v41 }
 0x37d   :  { %999 = vrcp.f32 %v598_v5 }
 0x37e   :  { %1001 = vrcp.f32 %v601_v20 }
 0x37f   :  { %v607_v6 = vpop.xlane.xlu0 %606  ;;  %v998_v18 = vpop.eup %997 }
 0x380   :  { %v967_v7 = vpop.permute.xlu1 %966  ;;  %v333_v22 = vmul.f32 %v998_v18, %v1140_v48 }
 0x381   :  { %v969_v9 = vunpack.i.h.bf16 %v967_v7  ;;  %v968_v26 = vunpack.i.l.bf16 %v967_v7 }
 0x383   :  { %v962_v8 = vpop.permute.xlu0 %961  ;;  %v925_v15 = vpack.c.bf16 %v969_v9, %v968_v26 }
 0x384   :  { %v964_v10 = vunpack.i.h.bf16 %v962_v8  ;;  %v963_v11 = vunpack.i.l.bf16 %v962_v8 }
 0x386   :  { %v909_v12 = vpack.c.bf16 %v964_v10, %v963_v11 }
 0x387   :  { %v1000_v21 = vpop.eup %999 }
 0x388   :  { %910 = vmatprep.subr.bf16.mxu0 %v909_v12  ;;  %v612_v24 = vmul.f32 %v1000_v21, %v986_v55  ;;  %v1002_v31 = vpop.eup %1001 }
 0x389   :  { %912 = vmatpush3.bf16.msra.mxu0 %v909_v12  ;;  %v613_v33 = vmul.f32 %v1002_v31, %v1144_v54 }
 0x38a   :  { %926 = vmatprep.subr.bf16.mxu0 %v925_v15 }
 0x38c   :  { %852 = vmatmul.mubr.msk.f32.vlgmr.msra.gmra.mrb[8].mxu0 %vm23_vm0, %v331_v17 }
 0x38d   :  { %854 = vmatprep.mubr.msk.f32.mxu0 %vm23_vm0, %v332_v19  ;;  %928 = vmatpush3.bf16.msra.mxu0 %v925_v15 }
 0x390   :  { %855 = vmatmul.mubr.msk.f32.gmra.mrb[10].mxu0 %vm23_vm0, %v333_v22 }
 0x391   :  { %879 = vmatprep.mubr.msk.f32.mxu0 %vm23_vm0, %v612_v24 }
 0x3b1   :  { %v604_v25 = vpop.xlane.xlu1 %603 }
 0x3b2   :  { %1003 = vrcp.f32 %v604_v25 }
 0x3b3   :  { %1005 = vrcp.f32 %v607_v6 }
 0x3b5   :  { %v972_v27 = vpop.permute.xlu1 %971 }
 0x3b6   :  { %v974_v28 = vunpack.i.h.bf16 %v972_v27  ;;  %v973_v29 = vunpack.i.l.bf16 %v972_v27 }
 0x3b8   :  { %v929_v30 = vpack.c.bf16 %v974_v28, %v973_v29 }
 0x3ba   :  { %930 = vmatprep.subr.bf16.mxu0 %v929_v30 }
 0x3bb   :  { %932 = vmatpush3.bf16.msra.mxu0 %v929_v30 }
 0x3bc   :  { %v1004_v32 = vpop.eup %1003 }
 0x3bd   :  { %v1006_v34 = vpop.eup %1005  ;;  %v614_v16 = vmul.f32 %v1004_v32, %v990_v62 }
 0x3be   :  { %880 = vmatmul.mubr.msk.f32.vlgmr.msra.gmra.mrb[12].mxu0 %vm23_vm0, %v613_v33  ;;  %v615_v35 = vmul.f32 %v1006_v34, %v1149_v58 }
 0x3bf   :  { %882 = vmatprep.mubr.msk.f32.mxu0 %vm23_vm0, %v614_v16 }
 0x3c2   :  { %883 = vmatmul.mubr.msk.f32.gmra.mrb[14].mxu0 %vm23_vm0, %v615_v35 }
 0x45f   :  { %v853_v36 = vpop.f32.mrb[8].mxu0 }
 0x460   :  { %444 = vst.msk [vmem:[%s1208_s2 + $0x8] sm:$0xff] %vm180_vm1, %v853_v36  ;;  %v424_v37 = vpop.f32.mrb[9].mxu0 }
 0x461   :  { %443 = vst.msk [vmem:[%s1208_s2] sm:$0xff] %vm180_vm1, %v424_v37 }
 0x463   :  { %v856_v38 = vpop.f32.mrb[10].mxu0 }
 0x464   :  { %446 = vst.msk [vmem:[%s1208_s2 + $0x18] sm:$0xff] %vm180_vm1, %v856_v38  ;;  %v434_v39 = vpop.f32.mrb[11].mxu0 }
 0x465   :  { %445 = vst.msk [vmem:[%s1208_s2 + $0x10] sm:$0xff] %vm180_vm1, %v434_v39 }
 0x491   :  { %v881_v40 = vpop.f32.mrb[12].mxu0 }
 0x492   :  { %726 = vst.msk [vmem:[%s1208_s2 + $0x28] sm:$0xff] %vm180_vm1, %v881_v40  ;;  %v706_v41 = vpop.f32.mrb[13].mxu0 }
 0x493   :  { %725 = vst.msk [vmem:[%s1208_s2 + $0x20] sm:$0xff] %vm180_vm1, %v706_v41 }
 0x495   :  { %v884_v42 = vpop.f32.mrb[14].mxu0 }
 0x496   :  { %728 = vst.msk [vmem:[%s1208_s2 + $0x38] sm:$0xff] %vm180_vm1, %v884_v42  ;;  %v716_v43 = vpop.f32.mrb[15].mxu0 }
 0x497   :  { %727 = vst.msk [vmem:[%s1208_s2 + $0x30] sm:$0xff] %vm180_vm1, %v716_v43 }

</bundles_post_ra>
